<compile_context>
chip_gen: v7x
topology: tpu7x:2x2x1
jax: 0.10.0
libtpu: 0.0.40
codegen_flags: <defaults>
</compile_context>

<pallas_src>
import math

import numpy as np
import jax
import jax.numpy as jnp
from jax import lax
from jax.experimental import pallas as pl
from jax.experimental.pallas import tpu as pltpu


# ----------------------------------------------------------------------------
# Glue: torchvision-style RandomResizedCrop.get_params (deterministic numpy RNG)
# ----------------------------------------------------------------------------
def sample_crop_params(h, w, seed, scale=(0.08, 1.0), ratio=(3.0 / 4.0, 4.0 / 3.0)):
    rng = np.random.RandomState(seed)
    area = h * w
    log_ratio = (math.log(ratio[0]), math.log(ratio[1]))
    for _ in range(10):
        target_area = area * rng.uniform(scale[0], scale[1])
        aspect = math.exp(rng.uniform(log_ratio[0], log_ratio[1]))
        wc = int(round(math.sqrt(target_area * aspect)))
        hc = int(round(math.sqrt(target_area / aspect)))
        if 0 < wc <= w and 0 < hc <= h:
            i = int(rng.randint(0, h - hc + 1))
            j = int(rng.randint(0, w - wc + 1))
            return i, j, hc, wc
    # fallback: center crop matching ratio bounds
    in_ratio = float(w) / float(h)
    if in_ratio < ratio[0]:
        wc = w
        hc = int(round(wc / ratio[0]))
    elif in_ratio > ratio[1]:
        hc = h
        wc = int(round(hc * ratio[1]))
    else:
        wc, hc = w, h
    i = (h - hc) // 2
    j = (w - wc) // 2
    return i, j, hc, wc


# ----------------------------------------------------------------------------
# Glue: bilinear interpolation matrix (align_corners=False) with crop offset baked in
# ----------------------------------------------------------------------------
def interp_matrix(out_size, in_size, crop_start, crop_len, dtype=jnp.float32):
    out_idx = jnp.arange(out_size)
    src = (out_idx.astype(jnp.float32) + 0.5) * (crop_len / out_size) - 0.5
    src = jnp.clip(src, 0.0, float(crop_len - 1))
    lo = jnp.floor(src).astype(jnp.int32)
    hi = jnp.minimum(lo + 1, crop_len - 1)
    frac = src - lo.astype(jnp.float32)
    W = jnp.zeros((out_size, in_size), dtype)
    W = W.at[out_idx, crop_start + lo].add((1.0 - frac).astype(dtype))
    W = W.at[out_idx, crop_start + hi].add(frac.astype(dtype))
    return W


# ----------------------------------------------------------------------------
# Generation-aware VMEM capacity (v7x: 64 MiB, v5e/v6e: 128 MiB)
# ----------------------------------------------------------------------------
def _vmem_capacity_bytes():
    try:
        info = pltpu.get_tpu_info()
        v = getattr(info, "vmem_capacity_bytes", None)
        if v:
            return int(v)
    except Exception:
        pass
    return 64 * 1024 * 1024  # conservative default (v7x)


# ----------------------------------------------------------------------------
# Tiling heuristics
# ----------------------------------------------------------------------------
def _choose_tiling(b, h, w, itemsize, vmem_budget):
    """Returns (tb, q, aligned).

    tb      : images per grid step (multiple of q), sized against the VMEM budget.
    q       : images stacked (via block-diag Wy) into one H-direction matmul so M = q*h >= 128.
    aligned : True if h is sublane-aligned for this dtype (layout-free flatten reshapes).
    """
    sub = 8 * max(1, 4 // itemsize)           # sublane tile: 8 for f32, 16 for bf16
    aligned = (h % sub == 0)

    q = 1
    if aligned and h < 128:
        q = max(1, min(b, -(-128 // h)))      # ceil(128/h), capped by batch

    # Per-image VMEM (lane/sublane padded): double-buffered in + out blocks + f32 intermediates.
    hp = -(-h // 8) * 8
    wp = -(-w // 128) * 128
    per_img = (4 * itemsize + 8) * hp * wp
    # Weight matrices (f32, double-buffered by default pipelining) also live in VMEM.
    wgt = 2 * ((q * h) ** 2 + w * w) * 4
    # TODO(synk): for very large W the Wx^T weight alone may exceed the budget; needs W-tiling.
    avail = max(per_img, vmem_budget - wgt)
    max_tb = max(1, int(avail // per_img))

    q = min(q, max_tb, b)
    max_tb = max(q, min(max_tb, b))

    # Candidate tile sizes = multiples of q. Prefer (in order): least per-TensorCore work assuming
    # the "parallel" axis is split across v7x's 2 TCs, then fewer grid steps, then less ragged
    # padding in the final (cdiv) block.
    best_tb, best_key = q, None
    for tb in range(q, max_tb + 1, q):
        steps = -(-b // tb)
        per_core = ((steps + 1) // 2) * tb
        key = (per_core, steps, steps * tb - b)
        if best_key is None or key < best_key:
            best_key, best_tb = key, tb
    return best_tb, q, aligned


# ----------------------------------------------------------------------------
# Pallas kernel factory: per grid step, resize TB images
#   x block : (TB, H, W)
#   wyq     : (q*H, q*H)  block-diagonal kron(I_q, Wy), f32
#   wxt     : (W, W)      Wx^T, f32
# ----------------------------------------------------------------------------
def _make_kernel(tb, q, h, w, aligned, unroll_limit=8):
    n_slab = tb // q

    def kernel(wyq_ref, wxt_ref, x_ref, o_ref):
        wxt = wxt_ref[...]      # (W, W) f32
        wyq = wyq_ref[...]      # (q*H, q*H) f32

        if aligned:
            xb = x_ref[...]                                           # (TB, H, W)
            # W-direction resize: ONE flattened big-M MXU matmul; the reshape is layout-free
            # because H is sublane-aligned for this dtype.
            y1 = jnp.dot(xb.reshape(tb * h, w), wxt,
                         preferred_element_type=jnp.float32)          # (TB*H, W) f32
            y1 = y1.reshape(n_slab, q * h, w)

            # H-direction resize: block-diag(Wy) over slabs of q images (M = q*H fills the MXU).
            def do_slab(start, y_slab):
                out = jnp.dot(wyq, y_slab, preferred_element_type=jnp.float32)
                o_ref[pl.ds(start, q)] = out.reshape(q, h, w).astype(o_ref.dtype)

            if n_slab <= unroll_limit:
                for s in range(n_slab):
                    do_slab(s * q, y1[s])
            else:
                def body(s, carry):
                    do_slab(pl.multiple_of(s * q, q), y1[s])
                    return carry
                lax.fori_loop(0, n_slab, body, 0)
        else:
            # H not sublane-aligned for this dtype: flattening would force a VMEM relayout every
            # step, so fall back to per-image matmuls (q == 1 here, wyq == Wy).
            def do_img(g):
                t = jnp.dot(x_ref[g], wxt, preferred_element_type=jnp.float32)
                o_ref[g] = jnp.dot(wyq, t,
                                   preferred_element_type=jnp.float32).astype(o_ref.dtype)

            if tb <= unroll_limit:
                for g in range(tb):
                    do_img(g)
            else:
                def body(g, carry):
                    do_img(g)
                    return carry
                lax.fori_loop(0, tb, body, 0)

    return kernel


# ----------------------------------------------------------------------------
# Wrapper
# ----------------------------------------------------------------------------
def random_resized_crop_pallas(x, seed=0):
    """x: (N, C, H, W) array. Returns (N, C, H, W) (same dtype; ints are cast/rounded back)."""
    n, c, h, w = x.shape
    orig_dtype = x.dtype
    if not jnp.issubdtype(orig_dtype, jnp.floating):
        x = x.astype(jnp.float32)     # v7x MXU has no int path; keep semantics, round back below
    dtype = x.dtype
    itemsize = jnp.dtype(dtype).itemsize

    i, j, hc, wc = sample_crop_params(h, w, seed)
    wy = interp_matrix(h, h, i, hc, jnp.float32)           # (H_out, H_in)
    wxt = interp_matrix(w, w, j, wc, jnp.float32).T        # (W_in, W_out)

    b = n * c
    x_flat = x.reshape(b, h, w)       # free, contiguous view — no host-side transposes

    vmem = _vmem_capacity_bytes()
    vmem_budget = max(16 << 20, (vmem * 3) // 8)           # ~24 MiB on v7x, ~48 MiB on v5e/v6e
    vmem_limit = min((vmem * 3) // 4, 100 << 20)           # ~48 MiB on v7x, ~96 MiB on v5e/v6e

    tb, q, aligned = _choose_tiling(b, h, w, itemsize, vmem_budget)
    wyq = wy if q == 1 else jnp.kron(jnp.eye(q, dtype=jnp.float32), wy)

    steps = pl.cdiv(b, tb)
    b_pad = steps * tb
    flops = 2 * b_pad * h * w * (w + q * h)                # W-dir + block-diag-inflated H-dir
    bytes_accessed = 2 * b * h * w * itemsize + ((q * h) ** 2 + w * w) * 4

    out_flat = pl.pallas_call(
        _make_kernel(tb, q, h, w, aligned),
        out_shape=jax.ShapeDtypeStruct((b, h, w), dtype),
        grid_spec=pltpu.PrefetchScalarGridSpec(
            num_scalar_prefetch=0,
            grid=(steps,),
            in_specs=[
                pl.BlockSpec((q * h, q * h), lambda g: (0, 0)),   # block-diag Wy (constant index
                pl.BlockSpec((w, w), lambda g: (0, 0)),           #  -> not re-DMA'd per step)
                pl.BlockSpec((tb, h, w), lambda g: (g, 0, 0)),
            ],
            out_specs=pl.BlockSpec((tb, h, w), lambda g: (g, 0, 0)),
        ),
        compiler_params=pltpu.CompilerParams(
            dimension_semantics=("parallel",),
            vmem_limit_bytes=int(vmem_limit),
        ),
        cost_estimate=pl.CostEstimate(
            flops=int(flops),
            transcendentals=0,
            bytes_accessed=int(bytes_accessed),
        ),
    )(wyq, wxt, x_flat)

    out = out_flat.reshape(n, c, h, w)
    if not jnp.issubdtype(orig_dtype, jnp.floating):
        info = jnp.iinfo(orig_dtype)
        out = jnp.clip(jnp.round(out), info.min, info.max).astype(orig_dtype)
    return out


# ----------------------------------------------------------------------------
# Pure-JAX reference (same crop params, same bilinear math) for sanity check
# ----------------------------------------------------------------------------
def _reference(x, seed=0):
    n, c, h, w = x.shape
    i, j, hc, wc = sample_crop_params(h, w, seed)
    wy = interp_matrix(h, h, i, hc, jnp.float32)
    wx = interp_matrix(w, w, j, wc, jnp.float32)
    return jnp.einsum("oh,nchw,pw->ncop", wy, x.astype(jnp.float32), wx).astype(x.dtype)


if __name__ == "__main__":
    key = jax.random.PRNGKey(0)
    n, c, h, w = 2, 4, 16, 16
    x = jax.random.normal(key, (n, c, h, w), dtype=jnp.float32)

    out = random_resized_crop_pallas(x, seed=0)
    out = jax.block_until_ready(out)

    ref = jax.block_until_ready(_reference(x, seed=0))
    assert out.shape == (n, c, h, w)
    np.testing.assert_allclose(np.asarray(out), np.asarray(ref), atol=1e-5, rtol=1e-5)

    print("KERNEL_OK")
</pallas_src>

<mosaic_0001>
module attributes {stable_mosaic.version = 11 : i64} {
  func.func @kernel(%arg0: i32, %arg1: memref<128x128xf32, #tpu.memory_space<vmem>>, %arg2: memref<16x16xf32, #tpu.memory_space<vmem>>, %arg3: memref<8x16x16xf32, #tpu.memory_space<vmem>>, %arg4: memref<8x16x16xf32, #tpu.memory_space<vmem>>) attributes {dimension_semantics = [#tpu.dimension_semantics<parallel>], iteration_bounds = array<i64: 1>, scalar_prefetch = 0 : i64, scratch_operands = 0 : i64, tpu.core_type = #tpu.core_type<tc>, window_params = [{pipeline_mode = #tpu.pipeline_mode<synchronous>, transform_indices = @transform_0, window_bounds = array<i64: 128, 128>}, {pipeline_mode = #tpu.pipeline_mode<synchronous>, transform_indices = @transform_1, window_bounds = array<i64: 16, 16>}, {transform_indices = @transform_2, window_bounds = array<i64: 8, 16, 16>}, {transform_indices = @transform_3, window_bounds = array<i64: 8, 16, 16>}]} {
    %c0 = arith.constant 0 : index
    %c0_0 = arith.constant 0 : index
    %0 = vector.load %arg2[%c0, %c0_0] : memref<16x16xf32, #tpu.memory_space<vmem>>, vector<16x16xf32>
    %c0_1 = arith.constant 0 : index
    %c0_2 = arith.constant 0 : index
    %1 = vector.load %arg1[%c0_1, %c0_2] : memref<128x128xf32, #tpu.memory_space<vmem>>, vector<128x128xf32>
    %c0_3 = arith.constant 0 : index
    %c0_4 = arith.constant 0 : index
    %c0_5 = arith.constant 0 : index
    %2 = vector.load %arg3[%c0_3, %c0_4, %c0_5] : memref<8x16x16xf32, #tpu.memory_space<vmem>>, vector<8x16x16xf32>
    %3 = vector.shape_cast %2 : vector<8x16x16xf32> to vector<128x16xf32>
    %cst = arith.constant dense<0.000000e+00> : vector<128x16xf32>
    %4 = tpu.matmul %3, %0, %cst {dimension_numbers = #tpu.dot_dimension_numbers<[1], [0], [0], [1], [0, 0, 1, 1], [], []>} : vector<128x16xf32>, vector<16x16xf32>, vector<128x16xf32> -> vector<128x16xf32>
    %5 = vector.shape_cast %4 : vector<128x16xf32> to vector<1x128x16xf32>
    %6 = vector.shape_cast %5 : vector<1x128x16xf32> to vector<128x16xf32>
    %cst_6 = arith.constant dense<0.000000e+00> : vector<128x16xf32>
    %7 = tpu.matmul %1, %6, %cst_6 {dimension_numbers = #tpu.dot_dimension_numbers<[1], [0], [0], [1], [0, 0, 1, 1], [], []>} : vector<128x128xf32>, vector<128x16xf32>, vector<128x16xf32> -> vector<128x16xf32>
    %8 = vector.shape_cast %7 : vector<128x16xf32> to vector<8x16x16xf32>
    %c0_7 = arith.constant 0 : index
    %c0_8 = arith.constant 0 : index
    %c0_9 = arith.constant 0 : index
    %9 = vector.load %arg4[%c0_7, %c0_8, %c0_9] : memref<8x16x16xf32, #tpu.memory_space<vmem>>, vector<8x16x16xf32>
    tpu.vector_store %arg4[%c0_7, %c0_8, %c0_9], %8 {strides = array<i32>} : memref<8x16x16xf32, #tpu.memory_space<vmem>>, vector<8x16x16xf32>,
    return
  }
  func.func @transform_0(%arg0: i32) -> (i32, i32) {
    %c0_i32 = arith.constant 0 : i32
    %c0_i32_0 = arith.constant 0 : i32
    %c0_i32_1 = arith.constant 0 : i32
    return %c0_i32, %c0_i32_0 : i32, i32
  }
  func.func @transform_1(%arg0: i32) -> (i32, i32) {
    %c0_i32 = arith.constant 0 : i32
    %c0_i32_0 = arith.constant 0 : i32
    %c0_i32_1 = arith.constant 0 : i32
    return %c0_i32, %c0_i32_0 : i32, i32
  }
  func.func @transform_2(%arg0: i32) -> (i32, i32, i32) {
    %c0_i32 = arith.constant 0 : i32
    %c0_i32_0 = arith.constant 0 : i32
    %c0_i32_1 = arith.constant 0 : i32
    return %arg0, %c0_i32, %c0_i32_0 : i32, i32, i32
  }
  func.func @transform_3(%arg0: i32) -> (i32, i32, i32) {
    %c0_i32 = arith.constant 0 : i32
    %c0_i32_0 = arith.constant 0 : i32
    %c0_i32_1 = arith.constant 0 : i32
    return %arg0, %c0_i32, %c0_i32_0 : i32, i32, i32
  }
}

</mosaic_0001>

<bundles_post_ra>
// kernel: tpu_custom_call.1
= control target key start
LH: loop header
LB: loop body
LE: loop exit
PB: predicated region body
PF: predicated region fallthrough
CT: control target
= control target key end

     0   :  { %8 = vsyncpa [#allocation3], 0  ;;  %s890_s0 = inlined_call_operand.hbm [shape: f32[128,128], index: 0, kind: input, shape index: {}]   ;;  %s891_s1 = inlined_call_operand.hbm [shape: f32[16,16], index: 1, kind: input, shape index: {}]   ;;  %s892_s2 = inlined_call_operand.hbm [shape: f32[8,16,16], index: 2, kind: input, shape index: {}]   ;;  %s893_s3 = inlined_call_operand.hbm [shape: f32[8,16,16], index: 3, kind: output, shape index: {}]  }
   0x1   :  { %9 = vsyncpa [#allocation6], 0 }
   0x2   :  { %10 = vsyncpa [#allocation4], 0  ;;  %s765_s12 = smov [#allocation5]   ;;  %s766_s14 = smov [#allocation2]  }
   0x3   :  { %s28_s13 = sshll.u32 %s765_s12, 4  ;;  %s16_s15 = sshll.u32 %s766_s14, 4  ;;  %s29_s13 = int_to_ptr.vmem [resolvable:$true] %s28_s13  ;;  %s791_s15 = int_to_ptr.vmem [resolvable:$true] %s16_s15 }
   0x4   :  { %s671_s18 = scalar_lea.hbm %s891_s1, 256 }
   0x5   :  { %p672_p0 = scmp.ne.s32.totalorder %s891_s1, %s671_s18  ;;  %p675_p1 = scmp.lt.u32.totalorder %s671_s18, %s891_s1 }
   0x7   :  { %p677_p2 = pnand %p675_p1, %p672_p0 }
   0x9   :  { %680 = shalt.err (!%p677_p2)
}
   0xa   :  { %s681_s23 = scalar_lea.vmem %s29_s13, 256  ;;  %p686_p4 = scmp.lt.s32.totalorder %s29_s13, %s29_s13 }
   0xb   :  { %p682_p3 = scmp.ne.s32.totalorder %s29_s13, %s681_s23  ;;  %p687_p5 = scmp.lt.s32.totalorder %s681_s23, %s681_s23 }
   0xd   :  { %p688_p6 = por %p687_p5, %p686_p4 }
   0xf   :  { %p689_p7 = pnand %p688_p6, %p682_p3 }
  0x11   :  { %692 = shalt.err (!%p689_p7)
}
  0x12   :  { %s767_s24 = smov 128   ;;  %s768_s25 = smov 8  }
  0x13   :  { %34 = dma.hbm_to_vmem [thread:$0]  %s891_s1, 256, %s29_s13, [#allocation6], %s767_s24, %s767_s24, %s768_s25  }
  0x14   :  { %s693_s30 = scalar_lea.hbm %s890_s0, 2048 }
  0x15   :  { %p694_p8 = scmp.ne.s32.totalorder %s890_s0, %s693_s30  ;;  %p697_p9 = scmp.lt.u32.totalorder %s693_s30, %s890_s0 }
  0x17   :  { %p699_p10 = pnand %p697_p9, %p694_p8 }
  0x19   :  { %702 = shalt.err (!%p699_p10)
}
  0x1a   :  { %s703_s8 = scalar_lea.vmem %s791_s15, 2048  ;;  %p708_p12 = scmp.lt.s32.totalorder %s791_s15, %s791_s15 }
  0x1b   :  { %p704_p11 = scmp.ne.s32.totalorder %s791_s15, %s703_s8  ;;  %p709_p13 = scmp.lt.s32.totalorder %s703_s8, %s703_s8 }
  0x1d   :  { %p710_p0 = por %p709_p13, %p708_p12 }
  0x1f   :  { %p711_p1 = pnand %p710_p0, %p704_p11 }
  0x21   :  { %714 = shalt.err (!%p711_p1)
}
  0x22   :  { %22 = dma.hbm_to_vmem [thread:$0]  %s890_s0, 2048, %s791_s15, [#allocation3], %s767_s24, %s767_s24, %s768_s25  }
  0x23   :  { %s769_s10 = smov [#allocation7]   ;;  %s715_s14 = scalar_lea.hbm %s892_s2, 2048 }
  0x24   :  { %s40_s11 = sshll.u32 %s769_s10, 4  ;;  %p716_p2 = scmp.ne.s32.totalorder %s892_s2, %s715_s14  ;;  %s41_s11 = int_to_ptr.vmem [resolvable:$true] %s40_s11 }
  0x25   :  { %p719_p3 = scmp.lt.u32.totalorder %s715_s14, %s892_s2 }
  0x27   :  { %p721_p4 = pnand %p719_p3, %p716_p2 }
  0x29   :  { %724 = shalt.err (!%p721_p4)
}
  0x2a   :  { %s725_s20 = scalar_lea.vmem %s41_s11, 2048  ;;  %p730_p6 = scmp.lt.s32.totalorder %s41_s11, %s41_s11 }
  0x2b   :  { %p726_p5 = scmp.ne.s32.totalorder %s41_s11, %s725_s20  ;;  %p731_p7 = scmp.lt.s32.totalorder %s725_s20, %s725_s20 }
  0x2d   :  { %p732_p8 = por %p731_p7, %p730_p6 }
  0x2f   :  { %p733_p9 = pnand %p732_p8, %p726_p5 }
  0x31   :  { %736 = shalt.err (!%p733_p9)
}
  0x32   :  { %46 = dma.hbm_to_vmem [thread:$0]  %s892_s2, 2048, %s41_s11, [#allocation6], %s767_s24, %s767_s24, %s768_s25  }
  0x33   :  { %759 = dma.done.wait [#allocation3], 2048  }
  0x34   :  { %760 = vsyncadd [#allocation3], 4294965248 }
  0x35   :  { %761 = dma.done.wait [#allocation6], 2304  }
  0x36   :  { %762 = vsyncadd [#allocation6], 4294964992  ;;  %vm90_vm0 = vcmask 130048   ;;  %v56_v0 = vld [vmem:[#allocation5] sm:$0xff]  ;;  %v57_v1 = vld [vmem:[#allocation5 + $0x8] sm:$0xff]  ;;  %s770_s2 = smov [#allocation8]  }
  0x37   :  { %v74_v2 = vld [vmem:[#allocation7] sm:$0xff]  ;;  %v613_v3 = vpack.c.bf16 %v57_v1, %v56_v0  ;;  %v75_v4 = vld [vmem:[#allocation7 + $0x8] sm:$0xff]  ;;  %v76_v5 = vld [vmem:[#allocation7 + $0x10] sm:$0xff]  ;;  %s450_s21 = sshll.u32 %s770_s2, 4  ;;  %s451_s21 = int_to_ptr.vmem [resolvable:$true] %s450_s21 }
  0x38   :  { %533 = vmatprep.mubr.msk.f32.mxu0 %vm90_vm0, %v74_v2  ;;  %v77_v6 = vld [vmem:[#allocation7 + $0x18] sm:$0xff]  ;;  %v78_v7 = vld [vmem:[#allocation7 + $0x20] sm:$0xff]  ;;  %v79_v8 = vld [vmem:[#allocation7 + $0x28] sm:$0xff]  ;;  %s737_s22 = scalar_lea.vmem %s451_s21, 2048  ;;  %p742_p11 = scmp.lt.s32.totalorder %s451_s21, %s451_s21 }
  0x39   :  { %614 = vmatprep.subr.bf16.mxu0 %v613_v3  ;;  %v80_v9 = vld [vmem:[#allocation7 + $0x30] sm:$0xff]  ;;  %v81_v10 = vld [vmem:[#allocation7 + $0x38] sm:$0xff]  ;;  %v82_v11 = vld [vmem:[#allocation7 + $0x40] sm:$0xff]  ;;  %p738_p10 = scmp.ne.s32.totalorder %s451_s21, %s737_s22  ;;  %p743_p12 = scmp.lt.s32.totalorder %s737_s22, %s737_s22 }
  0x3a   :  { %616 = vmatpush3.bf16.msra.mxu0 %v613_v3  ;;  %v83_v12 = vld [vmem:[#allocation7 + $0x48] sm:$0xff]  ;;  %v84_v13 = vld [vmem:[#allocation7 + $0x50] sm:$0xff]  ;;  %v85_v14 = vld [vmem:[#allocation7 + $0x58] sm:$0xff] }
  0x3b   :  { %v86_v15 = vld [vmem:[#allocation7 + $0x60] sm:$0xff]  ;;  %v87_v16 = vld [vmem:[#allocation7 + $0x68] sm:$0xff]  ;;  %v88_v17 = vld [vmem:[#allocation7 + $0x70] sm:$0xff]  ;;  %p744_p13 = por %p743_p12, %p742_p11 }
  0x3c   :  { %v89_v18 = vld [vmem:[#allocation7 + $0x78] sm:$0xff]  ;;  %v64_v19 = vld [vmem:[#allocation2 + $0x30] sm:$0xff]  ;;  %v58_v20 = vld [vmem:[#allocation2] sm:$0xff] }
  0x3d   :  { %534 = vmatmul.mubr.msk.f32.vlgmr.msra.gmra.mrb[0].mxu0 %vm90_vm0, %v75_v4  ;;  %598 = vmatprep.mubr.f32.mxu1 %v64_v19  ;;  %v65_v45 = vld [vmem:[#allocation2 + $0x38] sm:$0xff]  ;;  %v59_v46 = vld [vmem:[#allocation2 + $0x8] sm:$0xff]  ;;  %v66_v47 = vld [vmem:[#allocation2 + $0x40] sm:$0xff]  ;;  %p745_p0 = pnand %p744_p13, %p738_p10 }
  0x3e   :  { %536 = vmatprep.mubr.msk.f32.mxu0 %vm90_vm0, %v76_v5  ;;  %v60_v48 = vld [vmem:[#allocation2 + $0x10] sm:$0xff]  ;;  %v67_v49 = vld [vmem:[#allocation2 + $0x48] sm:$0xff]  ;;  %v61_v50 = vld [vmem:[#allocation2 + $0x18] sm:$0xff] }
  0x3f   :  { %v68_v51 = vld [vmem:[#allocation2 + $0x50] sm:$0xff]  ;;  %v62_v52 = vld [vmem:[#allocation2 + $0x20] sm:$0xff]  ;;  %v69_v53 = vld [vmem:[#allocation2 + $0x58] sm:$0xff] }
  0x40   :  { %v63_v54 = vld [vmem:[#allocation2 + $0x28] sm:$0xff]  ;;  %v70_v55 = vld [vmem:[#allocation2 + $0x60] sm:$0xff]  ;;  %v72_v57 = vld [vmem:[#allocation2 + $0x70] sm:$0xff] }
  0x41   :  { %537 = vmatmul.mubr.msk.f32.gmra.mrb[2].mxu0 %vm90_vm0, %v77_v6  ;;  %v71_v56 = vld [vmem:[#allocation2 + $0x68] sm:$0xff]  ;;  %v73_v58 = vld [vmem:[#allocation2 + $0x78] sm:$0xff] }
  0x42   :  { %539 = vmatprep.mubr.msk.f32.mxu0 %vm90_vm0, %v78_v7 }
  0x45   :  { %540 = vmatmul.mubr.msk.f32.gmra.mrb[4].mxu0 %vm90_vm0, %v79_v8 }
  0x46   :  { %542 = vmatprep.mubr.msk.f32.mxu0 %vm90_vm0, %v80_v9 }
  0x49   :  { %543 = vmatmul.mubr.msk.f32.gmra.mrb[6].mxu0 %vm90_vm0, %v81_v10 }
  0x4a   :  { %545 = vmatprep.mubr.msk.f32.mxu0 %vm90_vm0, %v82_v11 }
  0x4d   :  { %546 = vmatmul.mubr.msk.f32.gmra.mrb[8].mxu0 %vm90_vm0, %v83_v12 }
  0x4e   :  { %548 = vmatprep.mubr.msk.f32.mxu0 %vm90_vm0, %v84_v13 }
  0x51   :  { %549 = vmatmul.mubr.msk.f32.gmra.mrb[10].mxu0 %vm90_vm0, %v85_v14 }
  0x52   :  { %551 = vmatprep.mubr.msk.f32.mxu0 %vm90_vm0, %v86_v15 }
  0x55   :  { %552 = vmatmul.mubr.msk.f32.gmra.mrb[12].mxu0 %vm90_vm0, %v87_v16 }
  0x56   :  { %554 = vmatprep.mubr.msk.f32.mxu0 %vm90_vm0, %v88_v17 }
  0x59   :  { %555 = vmatmul.mubr.msk.f32.gmra.mrb[14].mxu0 %vm90_vm0, %v89_v18 }
  0x5a   :  { %589 = vmatprep.mubr.f32.mxu0 %v58_v20 }
 0x110   :  { %v535_v21 = vpop.f32.mrb[0].mxu0 }
 0x111   :  { %v205_v22 = vpop.f32.mrb[1].mxu0 }
 0x112   :  { %v617_v23 = vpack.c.bf16 %v535_v21, %v205_v22 }
 0x114   :  { %v538_v24 = vpop.f32.mrb[2].mxu0  ;;  %618 = vmatprep.subr.bf16.mxu0 %v617_v23  ;;  %649 = vmatprep.subr.bf16.mxu1 %v617_v23 }
 0x115   :  { %v215_v25 = vpop.f32.mrb[3].mxu0  ;;  %620 = vmatpush3.bf16.msra.mxu0 %v617_v23  ;;  %657 = vmatpush3.bf16.msra.mxu1 %v617_v23 }
 0x116   :  { %v621_v26 = vpack.c.bf16 %v538_v24, %v215_v25 }
 0x118   :  { %v541_v27 = vpop.f32.mrb[4].mxu0  ;;  %622 = vmatprep.subr.bf16.mxu0 %v621_v26  ;;  %650 = vmatprep.subr.bf16.mxu1 %v621_v26 }
 0x119   :  { %v225_v28 = vpop.f32.mrb[5].mxu0  ;;  %624 = vmatpush3.bf16.msra.mxu0 %v621_v26  ;;  %658 = vmatpush3.bf16.msra.mxu1 %v621_v26 }
 0x11a   :  { %v625_v29 = vpack.c.bf16 %v541_v27, %v225_v28 }
 0x11c   :  { %v544_v30 = vpop.f32.mrb[6].mxu0  ;;  %626 = vmatprep.subr.bf16.mxu0 %v625_v29  ;;  %651 = vmatprep.subr.bf16.mxu1 %v625_v29 }
 0x11d   :  { %v235_v31 = vpop.f32.mrb[7].mxu0  ;;  %628 = vmatpush3.bf16.msra.mxu0 %v625_v29  ;;  %659 = vmatpush3.bf16.msra.mxu1 %v625_v29 }
 0x11e   :  { %v629_v32 = vpack.c.bf16 %v544_v30, %v235_v31 }
 0x120   :  { %v547_v33 = vpop.f32.mrb[8].mxu0  ;;  %630 = vmatprep.subr.bf16.mxu0 %v629_v32  ;;  %652 = vmatprep.subr.bf16.mxu1 %v629_v32 }
 0x121   :  { %v245_v34 = vpop.f32.mrb[9].mxu0  ;;  %632 = vmatpush3.bf16.msra.mxu0 %v629_v32  ;;  %660 = vmatpush3.bf16.msra.mxu1 %v629_v32 }
 0x122   :  { %v633_v35 = vpack.c.bf16 %v547_v33, %v245_v34 }
 0x124   :  { %v550_v36 = vpop.f32.mrb[10].mxu0  ;;  %634 = vmatprep.subr.bf16.mxu0 %v633_v35  ;;  %653 = vmatprep.subr.bf16.mxu1 %v633_v35 }
 0x125   :  { %v255_v37 = vpop.f32.mrb[11].mxu0  ;;  %636 = vmatpush3.bf16.msra.mxu0 %v633_v35  ;;  %661 = vmatpush3.bf16.msra.mxu1 %v633_v35 }
 0x126   :  { %v637_v38 = vpack.c.bf16 %v550_v36, %v255_v37 }
 0x128   :  { %v553_v39 = vpop.f32.mrb[12].mxu0  ;;  %638 = vmatprep.subr.bf16.mxu0 %v637_v38  ;;  %654 = vmatprep.subr.bf16.mxu1 %v637_v38 }
 0x129   :  { %v265_v40 = vpop.f32.mrb[13].mxu0  ;;  %640 = vmatpush3.bf16.msra.mxu0 %v637_v38  ;;  %662 = vmatpush3.bf16.msra.mxu1 %v637_v38 }
 0x12a   :  { %v641_v41 = vpack.c.bf16 %v553_v39, %v265_v40 }
 0x12c   :  { %v556_v42 = vpop.f32.mrb[14].mxu0  ;;  %642 = vmatprep.subr.bf16.mxu0 %v641_v41  ;;  %655 = vmatprep.subr.bf16.mxu1 %v641_v41 }
 0x12d   :  { %v275_v43 = vpop.f32.mrb[15].mxu0  ;;  %644 = vmatpush3.bf16.msra.mxu0 %v641_v41  ;;  %663 = vmatpush3.bf16.msra.mxu1 %v641_v41 }
 0x12e   :  { %v645_v44 = vpack.c.bf16 %v556_v42, %v275_v43 }
 0x130   :  { %646 = vmatprep.subr.bf16.mxu0 %v645_v44  ;;  %656 = vmatprep.subr.bf16.mxu1 %v645_v44 }
 0x131   :  { %648 = vmatpush3.bf16.msra.mxu0 %v645_v44  ;;  %664 = vmatpush3.bf16.msra.mxu1 %v645_v44 }
 0x134   :  { %599 = vmatmul.mubr.f32.vlgmr.msra.gmra.mrb[0].mxu1 %v65_v45  ;;  %590 = vmatmul.mubr.f32.vlgmr.msra.gmra.mrb[16].mxu0 %v59_v46 }
 0x135   :  { %601 = vmatprep.mubr.f32.mxu1 %v66_v47  ;;  %592 = vmatprep.mubr.f32.mxu0 %v60_v48 }
 0x138   :  { %602 = vmatmul.mubr.f32.gmra.mrb[2].mxu1 %v67_v49  ;;  %593 = vmatmul.mubr.f32.gmra.mrb[18].mxu0 %v61_v50 }
 0x139   :  { %604 = vmatprep.mubr.f32.mxu1 %v68_v51  ;;  %595 = vmatprep.mubr.f32.mxu0 %v62_v52 }
 0x13c   :  { %605 = vmatmul.mubr.f32.gmra.mrb[4].mxu1 %v69_v53  ;;  %596 = vmatmul.mubr.f32.gmra.mrb[20].mxu0 %v63_v54 }
 0x13d   :  { %607 = vmatprep.mubr.f32.mxu1 %v70_v55 }
 0x140   :  { %608 = vmatmul.mubr.f32.gmra.mrb[6].mxu1 %v71_v56 }
 0x141   :  { %610 = vmatprep.mubr.f32.mxu1 %v72_v57 }
 0x144   :  { %611 = vmatmul.mubr.f32.gmra.mrb[8].mxu1 %v73_v58 }
 0x207   :  { %v600_v59 = vpop.f32.mrb[0].mxu1  ;;  %v591_v60 = vpop.f32.mrb[16].mxu0 }
 0x208   :  { %436 = vst.msk [vmem:[#allocation8 + $0x38] sm:$0xff] %vm90_vm0, %v600_v59  ;;  %v380_v61 = vpop.f32.mrb[1].mxu1  ;;  %430 = vst.msk [vmem:[#allocation8 + $0x8] sm:$0xff] %vm90_vm0, %v591_v60  ;;  %v350_v62 = vpop.f32.mrb[17].mxu0 }
 0x209   :  { %435 = vst.msk [vmem:[#allocation8 + $0x30] sm:$0xff] %vm90_vm0, %v380_v61  ;;  %429 = vst.msk [vmem:[#allocation8] sm:$0xff] %vm90_vm0, %v350_v62 }
 0x20b   :  { %v603_v63 = vpop.f32.mrb[2].mxu1  ;;  %v594_v0 = vpop.f32.mrb[18].mxu0 }
 0x20c   :  { %438 = vst.msk [vmem:[#allocation8 + $0x48] sm:$0xff] %vm90_vm0, %v603_v63  ;;  %v390_v1 = vpop.f32.mrb[3].mxu1  ;;  %432 = vst.msk [vmem:[#allocation8 + $0x18] sm:$0xff] %vm90_vm0, %v594_v0  ;;  %v360_v2 = vpop.f32.mrb[19].mxu0 }
 0x20d   :  { %437 = vst.msk [vmem:[#allocation8 + $0x40] sm:$0xff] %vm90_vm0, %v390_v1  ;;  %431 = vst.msk [vmem:[#allocation8 + $0x10] sm:$0xff] %vm90_vm0, %v360_v2 }
 0x20f   :  { %v606_v3 = vpop.f32.mrb[4].mxu1  ;;  %v597_v4 = vpop.f32.mrb[20].mxu0 }
 0x210   :  { %440 = vst.msk [vmem:[#allocation8 + $0x58] sm:$0xff] %vm90_vm0, %v606_v3  ;;  %v400_v5 = vpop.f32.mrb[5].mxu1  ;;  %434 = vst.msk [vmem:[#allocation8 + $0x28] sm:$0xff] %vm90_vm0, %v597_v4  ;;  %v370_v6 = vpop.f32.mrb[21].mxu0 }
 0x211   :  { %439 = vst.msk [vmem:[#allocation8 + $0x50] sm:$0xff] %vm90_vm0, %v400_v5  ;;  %433 = vst.msk [vmem:[#allocation8 + $0x20] sm:$0xff] %vm90_vm0, %v370_v6 }
 0x213   :  { %v609_v7 = vpop.f32.mrb[6].mxu1 }
 0x214   :  { %442 = vst.msk [vmem:[#allocation8 + $0x68] sm:$0xff] %vm90_vm0, %v609_v7  ;;  %v410_v8 = vpop.f32.mrb[7].mxu1 }
 0x215   :  { %441 = vst.msk [vmem:[#allocation8 + $0x60] sm:$0xff] %vm90_vm0, %v410_v8 }
 0x217   :  { %v612_v9 = vpop.f32.mrb[8].mxu1 }
 0x218   :  { %444 = vst.msk [vmem:[#allocation8 + $0x78] sm:$0xff] %vm90_vm0, %v612_v9  ;;  %v420_v10 = vpop.f32.mrb[9].mxu1 }
 0x219   :  { %443 = vst.msk [vmem:[#allocation8 + $0x70] sm:$0xff] %vm90_vm0, %v420_v10 }
 0x21a   :  { %748 = shalt.err (!%p745_p0)
}
 0x21b   :  { %s749_s27 = scalar_lea.hbm %s893_s3, 2048 }
 0x21c   :  { %p750_p1 = scmp.ne.s32.totalorder %s893_s3, %s749_s27  ;;  %p753_p2 = scmp.lt.u32.totalorder %s749_s27, %s893_s3 }
 0x21e   :  { %p755_p3 = pnand %p753_p2, %p750_p1 }
 0x220   :  { %758 = shalt.err (!%p755_p3)
}
 0x221   :  { %456 = dma.vmem_to_hbm [thread:$0]  %s451_s21, 2048, %s893_s3, [#allocation4], %s767_s24, %s767_s24, %s768_s25  }
 0x222   :  { %763 = dma.done.wait [#allocation4], 2048  }
 0x223   :  { %764 = vsyncadd [#allocation4], 4294965248 }
 0x224   :  { %460 = vsyncpa [#allocation3], 1 }
 0x225   :  { %461 = vsyncpa [#allocation6], 1 }
 0x226   :  { %462 = vsyncpa [#allocation4], 1 }

</bundles_post_ra>
